<compile_context>
chip_gen: v5e
topology: v5e:2x2
jax: 0.10.0
libtpu: 0.0.40
codegen_flags: <defaults>
</compile_context>

<pallas_src>
import functools

import jax
import jax.numpy as jnp
from jax.experimental import pallas as pl
from jax.experimental.pallas import tpu as pltpu


def fire_kernel(x_ref, wsq_ref, bsq_ref, we1_ref, be1_ref, w3_ref, be3_ref,
                o_ref, *, H, W, E1):
    """One batch element. x_ref: [1, Cin, H*W]; o_ref: [1, E1+E3, H*W]."""
    HW = H * W

    # ---- squeeze 1x1 conv (MXU, bf16 operands, f32 accumulate) + ReLU ----
    x = x_ref[0].astype(jnp.bfloat16)                       # [Cin, HW]
    sq = jnp.dot(wsq_ref[...].astype(jnp.bfloat16), x,
                 preferred_element_type=jnp.float32)        # [Sq, HW]
    sq = jnp.maximum(sq + bsq_ref[...], 0.0)                # bias [Sq,1] bcast
    sq_bf = sq.astype(jnp.bfloat16)
    Sq = sq.shape[0]

    # ---- expand 1x1 conv + ReLU, stored into channel rows [0, E1) ----
    e1 = jnp.dot(we1_ref[...].astype(jnp.bfloat16), sq_bf,
                 preferred_element_type=jnp.float32)        # [E1, HW]
    e1 = jnp.maximum(e1 + be1_ref[...], 0.0)
    o_ref[0, :E1, :] = e1

    # ---- expand 3x3 conv (padding=1) + ReLU, channel rows [E1, E1+E3) ----
    # Zero-pad the lane axis by 128 on each side (tile-aligned concat); each of
    # the 9 taps is then a static lane-offset slice (an XLU lane rotate).  Only
    # the W-direction wrap needs an explicit iota mask.
    E3 = w3_ref.shape[2]
    pad = jnp.zeros((Sq, 128), jnp.bfloat16)
    slab = jnp.concatenate([pad, sq_bf, pad], axis=1)       # [Sq, HW + 256]
    col = jax.lax.broadcasted_iota(jnp.int32, (1, HW), 1) % W

    w3 = w3_ref[...].astype(jnp.bfloat16)                   # [3, 3, E3, Sq]
    acc = jnp.zeros((E3, HW), jnp.float32)
    for ky in range(3):
        for kx in range(3):
            dy, dx = ky - 1, kx - 1
            start = 128 + dy * W + dx
            tap = slab[:, start:start + HW]                 # sq[l + dy*W + dx]
            if dx == -1:
                tap = jnp.where(col >= 1, tap, jnp.zeros_like(tap))
            elif dx == 1:
                tap = jnp.where(col <= W - 2, tap, jnp.zeros_like(tap))
            acc = acc + jnp.dot(w3[ky, kx], tap,
                                preferred_element_type=jnp.float32)
    e3 = jnp.maximum(acc + be3_ref[...], 0.0)               # [E3, HW]
    o_ref[0, E1:, :] = e3


def fire(x_nchw, params):
    """x_nchw: [N, Cin, H, W] f32 -> [N, E1+E3, H, W] f32 (PyTorch Fire)."""
    wsq, bsq, we1, be1, w3, be3 = params
    N, Cin, H, W = x_nchw.shape
    Sq = wsq.shape[0]
    E1 = we1.shape[0]
    E3 = w3.shape[0]
    Cout = E1 + E3
    HW = H * W

    x2 = x_nchw.reshape(N, Cin, HW)                         # free reshape
    w3t = jnp.transpose(w3, (2, 3, 0, 1))                   # [3, 3, E3, Sq]
    bsq2 = bsq.reshape(Sq, 1)
    be1_2 = be1.reshape(E1, 1)
    be3_2 = be3.reshape(E3, 1)

    kernel = functools.partial(fire_kernel, H=H, W=W, E1=E1)

    out = pl.pallas_call(
        kernel,
        out_shape=jax.ShapeDtypeStruct((N, Cout, HW), jnp.float32),
        grid=(N,),
        in_specs=[
            pl.BlockSpec((1, Cin, HW), lambda n: (n, 0, 0)),        # x
            pl.BlockSpec((Sq, Cin), lambda n: (0, 0)),              # squeeze W
            pl.BlockSpec((Sq, 1), lambda n: (0, 0)),                # squeeze b
            pl.BlockSpec((E1, Sq), lambda n: (0, 0)),               # expand1x1 W
            pl.BlockSpec((E1, 1), lambda n: (0, 0)),                # expand1x1 b
            pl.BlockSpec((3, 3, E3, Sq), lambda n: (0, 0, 0, 0)),   # expand3x3 W
            pl.BlockSpec((E3, 1), lambda n: (0, 0)),                # expand3x3 b
        ],
        out_specs=pl.BlockSpec((1, Cout, HW), lambda n: (n, 0, 0)),
        compiler_params=pltpu.CompilerParams(
            dimension_semantics=("parallel",)),
    )(x2, wsq, bsq2, we1, be1_2, w3t, be3_2)

    return out.reshape(N, Cout, H, W)                       # free reshape


def reference(x_nchw, params):
    """Pure-JAX f32 reference matching the PyTorch Fire forward."""
    wsq, bsq, we1, be1, w3, be3 = params
    sq = jax.nn.relu(jnp.einsum('sc,nchw->nshw', wsq, x_nchw)
                     + bsq[None, :, None, None])
    e1 = jax.nn.relu(jnp.einsum('es,nshw->nehw', we1, sq)
                     + be1[None, :, None, None])
    e3 = jax.lax.conv_general_dilated(
        sq, w3, window_strides=(1, 1), padding='SAME',
        dimension_numbers=('NCHW', 'OIHW', 'NCHW'))
    e3 = jax.nn.relu(e3 + be3[None, :, None, None])
    return jnp.concatenate([e1, e3], axis=1)


def init_params(key, inplanes, squeeze_planes, expand1x1_planes, expand3x3_planes):
    ks = jax.random.split(key, 6)
    # Same shapes as the PyTorch conv weights (1x1 kernels squeezed).
    wsq = 0.1 * jax.random.normal(ks[0], (squeeze_planes, inplanes), jnp.float32)
    bsq = 0.1 * jax.random.normal(ks[1], (squeeze_planes,), jnp.float32)
    we1 = 0.1 * jax.random.normal(ks[2], (expand1x1_planes, squeeze_planes), jnp.float32)
    be1 = 0.1 * jax.random.normal(ks[3], (expand1x1_planes,), jnp.float32)
    w3 = 0.1 * jax.random.normal(ks[4], (expand3x3_planes, squeeze_planes, 3, 3), jnp.float32)
    be3 = 0.1 * jax.random.normal(ks[5], (expand3x3_planes,), jnp.float32)
    return (wsq, bsq, we1, be1, w3, be3)


if __name__ == "__main__":
    N, inplanes, H, W = 2, 4, 16, 16
    squeeze_planes, expand1x1_planes, expand3x3_planes = 4, 8, 8

    key = jax.random.PRNGKey(0)
    kx, kp = jax.random.split(key)
    x = jax.random.normal(kx, (N, inplanes, H, W), jnp.float32)
    params = init_params(kp, inplanes, squeeze_planes,
                         expand1x1_planes, expand3x3_planes)

    out = jax.jit(fire)(x, params)
    out = jax.block_until_ready(out)

    ref = reference(x, params)
    assert out.shape == (N, expand1x1_planes + expand3x3_planes, H, W), out.shape
    max_err = float(jnp.max(jnp.abs(out - ref)))
    # bf16 MXU operands with f32 accumulation -> loosened tolerance vs f32 ref.
    assert jnp.allclose(out, ref, atol=3e-2, rtol=3e-2), max_err

    print("KERNEL_OK")
</pallas_src>

<mosaic_0001>
module attributes {stable_mosaic.version = 11 : i64} {
  func.func @fire_kernel(%arg0: i32, %arg1: memref<1x4x256xf32, #tpu.memory_space<vmem>>, %arg2: memref<4x4xf32, #tpu.memory_space<vmem>>, %arg3: memref<4x1xf32, #tpu.memory_space<vmem>>, %arg4: memref<8x4xf32, #tpu.memory_space<vmem>>, %arg5: memref<8x1xf32, #tpu.memory_space<vmem>>, %arg6: memref<3x3x8x4xf32, #tpu.memory_space<vmem>>, %arg7: memref<8x1xf32, #tpu.memory_space<vmem>>, %arg8: memref<1x16x256xf32, #tpu.memory_space<vmem>>) attributes {dimension_semantics = [#tpu.dimension_semantics<parallel>], iteration_bounds = array<i64: 2>, scalar_prefetch = 0 : i64, scratch_operands = 0 : i64, tpu.core_type = #tpu.core_type<tc>, window_params = [{transform_indices = @transform_0, window_bounds = array<i64: 1, 4, 256>}, {pipeline_mode = #tpu.pipeline_mode<synchronous>, transform_indices = @transform_1, window_bounds = array<i64: 4, 4>}, {pipeline_mode = #tpu.pipeline_mode<synchronous>, transform_indices = @transform_2, window_bounds = array<i64: 4, 1>}, {pipeline_mode = #tpu.pipeline_mode<synchronous>, transform_indices = @transform_3, window_bounds = array<i64: 8, 4>}, {pipeline_mode = #tpu.pipeline_mode<synchronous>, transform_indices = @transform_4, window_bounds = array<i64: 8, 1>}, {pipeline_mode = #tpu.pipeline_mode<synchronous>, transform_indices = @transform_5, window_bounds = array<i64: 3, 3, 8, 4>}, {pipeline_mode = #tpu.pipeline_mode<synchronous>, transform_indices = @transform_6, window_bounds = array<i64: 8, 1>}, {transform_indices = @transform_7, window_bounds = array<i64: 1, 16, 256>}]} {
    %c0 = arith.constant 0 : index
    %c0_0 = arith.constant 0 : index
    %c0_1 = arith.constant 0 : index
    %0 = vector.load %arg1[%c0, %c0_0, %c0_1] : memref<1x4x256xf32, #tpu.memory_space<vmem>>, vector<1x4x256xf32>
    %1 = vector.shape_cast %0 : vector<1x4x256xf32> to vector<4x256xf32>
    %2 = arith.truncf %1 : vector<4x256xf32> to vector<4x256xbf16>
    %c0_2 = arith.constant 0 : index
    %c0_3 = arith.constant 0 : index
    %3 = vector.load %arg2[%c0_2, %c0_3] : memref<4x4xf32, #tpu.memory_space<vmem>>, vector<4x4xf32>
    %4 = arith.truncf %3 : vector<4x4xf32> to vector<4x4xbf16>
    %cst = arith.constant dense<0.000000e+00> : vector<4x256xf32>
    %5 = tpu.matmul %4, %2, %cst {dimension_numbers = #tpu.dot_dimension_numbers<[1], [0], [0], [1], [0, 0, 1, 1], [], []>} : vector<4x4xbf16>, vector<4x256xbf16>, vector<4x256xf32> -> vector<4x256xf32>
    %c0_4 = arith.constant 0 : index
    %c0_5 = arith.constant 0 : index
    %6 = vector.load %arg3[%c0_4, %c0_5] : memref<4x1xf32, #tpu.memory_space<vmem>>, vector<4x1xf32>
    %7 = vector.broadcast %6 : vector<4x1xf32> to vector<4x256xf32>
    %8 = arith.addf %5, %7 : vector<4x256xf32>
    %cst_6 = arith.constant 0.000000e+00 : f32
    %9 = vector.broadcast %cst_6 : f32 to vector<4x256xf32>
    %10 = arith.maximumf %8, %9 : vector<4x256xf32>
    %11 = arith.truncf %10 : vector<4x256xf32> to vector<4x256xbf16>
    %c0_7 = arith.constant 0 : index
    %c0_8 = arith.constant 0 : index
    %12 = vector.load %arg4[%c0_7, %c0_8] : memref<8x4xf32, #tpu.memory_space<vmem>>, vector<8x4xf32>
    %13 = arith.truncf %12 : vector<8x4xf32> to vector<8x4xbf16>
    %cst_9 = arith.constant dense<0.000000e+00> : vector<8x256xf32>
    %14 = tpu.matmul %13, %11, %cst_9 {dimension_numbers = #tpu.dot_dimension_numbers<[1], [0], [0], [1], [0, 0, 1, 1], [], []>} : vector<8x4xbf16>, vector<4x256xbf16>, vector<8x256xf32> -> vector<8x256xf32>
    %c0_10 = arith.constant 0 : index
    %c0_11 = arith.constant 0 : index
    %15 = vector.load %arg5[%c0_10, %c0_11] : memref<8x1xf32, #tpu.memory_space<vmem>>, vector<8x1xf32>
    %16 = vector.broadcast %15 : vector<8x1xf32> to vector<8x256xf32>
    %17 = arith.addf %14, %16 : vector<8x256xf32>
    %cst_12 = arith.constant 0.000000e+00 : f32
    %18 = vector.broadcast %cst_12 : f32 to vector<8x256xf32>
    %19 = arith.maximumf %17, %18 : vector<8x256xf32>
    %c0_13 = arith.constant 0 : index
    %c0_14 = arith.constant 0 : index
    %c0_15 = arith.constant 0 : index
    %20 = vector.load %arg8[%c0_13, %c0_14, %c0_15] : memref<1x16x256xf32, #tpu.memory_space<vmem>>, vector<1x8x256xf32>
    %21 = vector.shape_cast %20 : vector<1x8x256xf32> to vector<8x256xf32>
    %22 = vector.shape_cast %19 : vector<8x256xf32> to vector<1x8x256xf32>
    tpu.vector_store %arg8[%c0_13, %c0_14, %c0_15], %22 {strides = array<i32>} : memref<1x16x256xf32, #tpu.memory_space<vmem>>, vector<1x8x256xf32>,
    %cst_16 = arith.constant 0.000000e+00 : bf16
    %23 = vector.broadcast %cst_16 : bf16 to vector<4x128xbf16>
    %24 = tpu.concatenate %23, %11, %23 in 1 : vector<4x128xbf16>, vector<4x256xbf16>, vector<4x128xbf16> -> vector<4x512xbf16>
    %25 = tpu.iota {dimensions = array<i32: 1>} : vector<1x256xi32>
    %c16_i32 = arith.constant 16 : i32
    %c0_i32 = arith.constant 0 : i32
    %26 = arith.cmpi eq, %c16_i32, %c0_i32 : i32
    %c1_i32 = arith.constant 1 : i32
    %27 = arith.select %26, %c1_i32, %c16_i32 : i32
    %28 = vector.broadcast %27 : i32 to vector<1x256xi32>
    %29 = arith.remsi %25, %28 : vector<1x256xi32>
    %c0_i32_17 = arith.constant 0 : i32
    %30 = vector.broadcast %c0_i32_17 : i32 to vector<1x256xi32>
    %31 = arith.cmpi ne, %29, %30 : vector<1x256xi32>
    %c0_i32_18 = arith.constant 0 : i32
    %32 = vector.broadcast %c0_i32_18 : i32 to vector<1x256xi32>
    %33 = arith.cmpi slt, %29, %32 : vector<1x256xi32>
    %c0_i32_19 = arith.constant 0 : i32
    %34 = arith.cmpi slt, %27, %c0_i32_19 : i32
    %35 = vector.broadcast %34 : i1 to vector<1x256xi1>
    %36 = vector.broadcast %35 : vector<1x256xi1> to vector<1x256xi1>
    %37 = arith.xori %33, %36 : vector<1x256xi1>
    %38 = arith.andi %37, %31 : vector<1x256xi1>
    %39 = vector.broadcast %27 : i32 to vector<1x256xi32>
    %40 = arith.addi %29, %39 : vector<1x256xi32>
    %41 = arith.select %38, %40, %29 : vector<1x256xi1>, vector<1x256xi32>
    %c0_20 = arith.constant 0 : index
    %c0_21 = arith.constant 0 : index
    %c0_22 = arith.constant 0 : index
    %c0_23 = arith.constant 0 : index
    %42 = vector.load %arg6[%c0_20, %c0_21, %c0_22, %c0_23] : memref<3x3x8x4xf32, #tpu.memory_space<vmem>>, vector<3x3x8x4xf32>
    %43 = arith.truncf %42 : vector<3x3x8x4xf32> to vector<3x3x8x4xbf16>
    %cst_24 = arith.constant 0.000000e+00 : f32
    %44 = vector.broadcast %cst_24 : f32 to vector<8x256xf32>
    %45 = vector.extract_strided_slice %24 {offsets = [0, 111], sizes = [4, 256], strides = [1, 1]} : vector<4x512xbf16> to vector<4x256xbf16>
    %c1_i32_25 = arith.constant 1 : i32
    %46 = vector.broadcast %c1_i32_25 : i32 to vector<1x256xi32>
    %47 = arith.cmpi sge, %41, %46 : vector<1x256xi32>
    %cst_26 = arith.constant 0.000000e+00 : bf16
    %48 = vector.broadcast %cst_26 : bf16 to vector<4x256xbf16>
    %49 = vector.shape_cast %47 : vector<1x256xi1> to vector<1x256xi1>
    %50 = vector.broadcast %49 : vector<1x256xi1> to vector<4x256xi1>
    %51 = arith.select %50, %45, %48 : vector<4x256xi1>, vector<4x256xbf16>
    %52 = vector.extract_strided_slice %43 {offsets = [0, 0, 0, 0], sizes = [1, 1, 8, 4], strides = [1, 1, 1, 1]} : vector<3x3x8x4xbf16> to vector<1x1x8x4xbf16>
    %53 = vector.shape_cast %52 : vector<1x1x8x4xbf16> to vector<8x4xbf16>
    %cst_27 = arith.constant dense<0.000000e+00> : vector<8x256xf32>
    %54 = tpu.matmul %53, %51, %cst_27 {dimension_numbers = #tpu.dot_dimension_numbers<[1], [0], [0], [1], [0, 0, 1, 1], [], []>} : vector<8x4xbf16>, vector<4x256xbf16>, vector<8x256xf32> -> vector<8x256xf32>
    %55 = arith.addf %44, %54 : vector<8x256xf32>
    %56 = vector.extract_strided_slice %24 {offsets = [0, 112], sizes = [4, 256], strides = [1, 1]} : vector<4x512xbf16> to vector<4x256xbf16>
    %57 = vector.extract_strided_slice %43 {offsets = [0, 1, 0, 0], sizes = [1, 1, 8, 4], strides = [1, 1, 1, 1]} : vector<3x3x8x4xbf16> to vector<1x1x8x4xbf16>
    %58 = vector.shape_cast %57 : vector<1x1x8x4xbf16> to vector<8x4xbf16>
    %cst_28 = arith.constant dense<0.000000e+00> : vector<8x256xf32>
    %59 = tpu.matmul %58, %56, %cst_28 {dimension_numbers = #tpu.dot_dimension_numbers<[1], [0], [0], [1], [0, 0, 1, 1], [], []>} : vector<8x4xbf16>, vector<4x256xbf16>, vector<8x256xf32> -> vector<8x256xf32>
    %60 = arith.addf %55, %59 : vector<8x256xf32>
    %61 = vector.extract_strided_slice %24 {offsets = [0, 113], sizes = [4, 256], strides = [1, 1]} : vector<4x512xbf16> to vector<4x256xbf16>
    %c14_i32 = arith.constant 14 : i32
    %62 = vector.broadcast %c14_i32 : i32 to vector<1x256xi32>
    %63 = arith.cmpi sle, %41, %62 : vector<1x256xi32>
    %cst_29 = arith.constant 0.000000e+00 : bf16
    %64 = vector.broadcast %cst_29 : bf16 to vector<4x256xbf16>
    %65 = vector.shape_cast %63 : vector<1x256xi1> to vector<1x256xi1>
    %66 = vector.broadcast %65 : vector<1x256xi1> to vector<4x256xi1>
    %67 = arith.select %66, %61, %64 : vector<4x256xi1>, vector<4x256xbf16>
    %68 = vector.extract_strided_slice %43 {offsets = [0, 2, 0, 0], sizes = [1, 1, 8, 4], strides = [1, 1, 1, 1]} : vector<3x3x8x4xbf16> to vector<1x1x8x4xbf16>
    %69 = vector.shape_cast %68 : vector<1x1x8x4xbf16> to vector<8x4xbf16>
    %cst_30 = arith.constant dense<0.000000e+00> : vector<8x256xf32>
    %70 = tpu.matmul %69, %67, %cst_30 {dimension_numbers = #tpu.dot_dimension_numbers<[1], [0], [0], [1], [0, 0, 1, 1], [], []>} : vector<8x4xbf16>, vector<4x256xbf16>, vector<8x256xf32> -> vector<8x256xf32>
    %71 = arith.addf %60, %70 : vector<8x256xf32>
    %72 = vector.extract_strided_slice %24 {offsets = [0, 127], sizes = [4, 256], strides = [1, 1]} : vector<4x512xbf16> to vector<4x256xbf16>
    %c1_i32_31 = arith.constant 1 : i32
    %73 = vector.broadcast %c1_i32_31 : i32 to vector<1x256xi32>
    %74 = arith.cmpi sge, %41, %73 : vector<1x256xi32>
    %cst_32 = arith.constant 0.000000e+00 : bf16
    %75 = vector.broadcast %cst_32 : bf16 to vector<4x256xbf16>
    %76 = vector.shape_cast %74 : vector<1x256xi1> to vector<1x256xi1>
    %77 = vector.broadcast %76 : vector<1x256xi1> to vector<4x256xi1>
    %78 = arith.select %77, %72, %75 : vector<4x256xi1>, vector<4x256xbf16>
    %79 = vector.extract_strided_slice %43 {offsets = [1, 0, 0, 0], sizes = [1, 1, 8, 4], strides = [1, 1, 1, 1]} : vector<3x3x8x4xbf16> to vector<1x1x8x4xbf16>
    %80 = vector.shape_cast %79 : vector<1x1x8x4xbf16> to vector<8x4xbf16>
    %cst_33 = arith.constant dense<0.000000e+00> : vector<8x256xf32>
    %81 = tpu.matmul %80, %78, %cst_33 {dimension_numbers = #tpu.dot_dimension_numbers<[1], [0], [0], [1], [0, 0, 1, 1], [], []>} : vector<8x4xbf16>, vector<4x256xbf16>, vector<8x256xf32> -> vector<8x256xf32>
    %82 = arith.addf %71, %81 : vector<8x256xf32>
    %83 = vector.extract_strided_slice %24 {offsets = [0, 128], sizes = [4, 256], strides = [1, 1]} : vector<4x512xbf16> to vector<4x256xbf16>
    %84 = vector.extract_strided_slice %43 {offsets = [1, 1, 0, 0], sizes = [1, 1, 8, 4], strides = [1, 1, 1, 1]} : vector<3x3x8x4xbf16> to vector<1x1x8x4xbf16>
    %85 = vector.shape_cast %84 : vector<1x1x8x4xbf16> to vector<8x4xbf16>
    %cst_34 = arith.constant dense<0.000000e+00> : vector<8x256xf32>
    %86 = tpu.matmul %85, %83, %cst_34 {dimension_numbers = #tpu.dot_dimension_numbers<[1], [0], [0], [1], [0, 0, 1, 1], [], []>} : vector<8x4xbf16>, vector<4x256xbf16>, vector<8x256xf32> -> vector<8x256xf32>
    %87 = arith.addf %82, %86 : vector<8x256xf32>
    %88 = vector.extract_strided_slice %24 {offsets = [0, 129], sizes = [4, 256], strides = [1, 1]} : vector<4x512xbf16> to vector<4x256xbf16>
    %c14_i32_35 = arith.constant 14 : i32
    %89 = vector.broadcast %c14_i32_35 : i32 to vector<1x256xi32>
    %90 = arith.cmpi sle, %41, %89 : vector<1x256xi32>
    %cst_36 = arith.constant 0.000000e+00 : bf16
    %91 = vector.broadcast %cst_36 : bf16 to vector<4x256xbf16>
    %92 = vector.shape_cast %90 : vector<1x256xi1> to vector<1x256xi1>
    %93 = vector.broadcast %92 : vector<1x256xi1> to vector<4x256xi1>
    %94 = arith.select %93, %88, %91 : vector<4x256xi1>, vector<4x256xbf16>
    %95 = vector.extract_strided_slice %43 {offsets = [1, 2, 0, 0], sizes = [1, 1, 8, 4], strides = [1, 1, 1, 1]} : vector<3x3x8x4xbf16> to vector<1x1x8x4xbf16>
    %96 = vector.shape_cast %95 : vector<1x1x8x4xbf16> to vector<8x4xbf16>
    %cst_37 = arith.constant dense<0.000000e+00> : vector<8x256xf32>
    %97 = tpu.matmul %96, %94, %cst_37 {dimension_numbers = #tpu.dot_dimension_numbers<[1], [0], [0], [1], [0, 0, 1, 1], [], []>} : vector<8x4xbf16>, vector<4x256xbf16>, vector<8x256xf32> -> vector<8x256xf32>
    %98 = arith.addf %87, %97 : vector<8x256xf32>
    %99 = vector.extract_strided_slice %24 {offsets = [0, 143], sizes = [4, 256], strides = [1, 1]} : vector<4x512xbf16> to vector<4x256xbf16>
    %c1_i32_38 = arith.constant 1 : i32
    %100 = vector.broadcast %c1_i32_38 : i32 to vector<1x256xi32>
    %101 = arith.cmpi sge, %41, %100 : vector<1x256xi32>
    %cst_39 = arith.constant 0.000000e+00 : bf16
    %102 = vector.broadcast %cst_39 : bf16 to vector<4x256xbf16>
    %103 = vector.shape_cast %101 : vector<1x256xi1> to vector<1x256xi1>
    %104 = vector.broadcast %103 : vector<1x256xi1> to vector<4x256xi1>
    %105 = arith.select %104, %99, %102 : vector<4x256xi1>, vector<4x256xbf16>
    %106 = vector.extract_strided_slice %43 {offsets = [2, 0, 0, 0], sizes = [1, 1, 8, 4], strides = [1, 1, 1, 1]} : vector<3x3x8x4xbf16> to vector<1x1x8x4xbf16>
    %107 = vector.shape_cast %106 : vector<1x1x8x4xbf16> to vector<8x4xbf16>
    %cst_40 = arith.constant dense<0.000000e+00> : vector<8x256xf32>
    %108 = tpu.matmul %107, %105, %cst_40 {dimension_numbers = #tpu.dot_dimension_numbers<[1], [0], [0], [1], [0, 0, 1, 1], [], []>} : vector<8x4xbf16>, vector<4x256xbf16>, vector<8x256xf32> -> vector<8x256xf32>
    %109 = arith.addf %98, %108 : vector<8x256xf32>
    %110 = vector.extract_strided_slice %24 {offsets = [0, 144], sizes = [4, 256], strides = [1, 1]} : vector<4x512xbf16> to vector<4x256xbf16>
    %111 = vector.extract_strided_slice %43 {offsets = [2, 1, 0, 0], sizes = [1, 1, 8, 4], strides = [1, 1, 1, 1]} : vector<3x3x8x4xbf16> to vector<1x1x8x4xbf16>
    %112 = vector.shape_cast %111 : vector<1x1x8x4xbf16> to vector<8x4xbf16>
    %cst_41 = arith.constant dense<0.000000e+00> : vector<8x256xf32>
    %113 = tpu.matmul %112, %110, %cst_41 {dimension_numbers = #tpu.dot_dimension_numbers<[1], [0], [0], [1], [0, 0, 1, 1], [], []>} : vector<8x4xbf16>, vector<4x256xbf16>, vector<8x256xf32> -> vector<8x256xf32>
    %114 = arith.addf %109, %113 : vector<8x256xf32>
    %115 = vector.extract_strided_slice %24 {offsets = [0, 145], sizes = [4, 256], strides = [1, 1]} : vector<4x512xbf16> to vector<4x256xbf16>
    %c14_i32_42 = arith.constant 14 : i32
    %116 = vector.broadcast %c14_i32_42 : i32 to vector<1x256xi32>
    %117 = arith.cmpi sle, %41, %116 : vector<1x256xi32>
    %cst_43 = arith.constant 0.000000e+00 : bf16
    %118 = vector.broadcast %cst_43 : bf16 to vector<4x256xbf16>
    %119 = vector.shape_cast %117 : vector<1x256xi1> to vector<1x256xi1>
    %120 = vector.broadcast %119 : vector<1x256xi1> to vector<4x256xi1>
    %121 = arith.select %120, %115, %118 : vector<4x256xi1>, vector<4x256xbf16>
    %122 = vector.extract_strided_slice %43 {offsets = [2, 2, 0, 0], sizes = [1, 1, 8, 4], strides = [1, 1, 1, 1]} : vector<3x3x8x4xbf16> to vector<1x1x8x4xbf16>
    %123 = vector.shape_cast %122 : vector<1x1x8x4xbf16> to vector<8x4xbf16>
    %cst_44 = arith.constant dense<0.000000e+00> : vector<8x256xf32>
    %124 = tpu.matmul %123, %121, %cst_44 {dimension_numbers = #tpu.dot_dimension_numbers<[1], [0], [0], [1], [0, 0, 1, 1], [], []>} : vector<8x4xbf16>, vector<4x256xbf16>, vector<8x256xf32> -> vector<8x256xf32>
    %125 = arith.addf %114, %124 : vector<8x256xf32>
    %c0_45 = arith.constant 0 : index
    %c0_46 = arith.constant 0 : index
    %126 = vector.load %arg7[%c0_45, %c0_46] : memref<8x1xf32, #tpu.memory_space<vmem>>, vector<8x1xf32>
    %127 = vector.broadcast %126 : vector<8x1xf32> to vector<8x256xf32>
    %128 = arith.addf %125, %127 : vector<8x256xf32>
    %cst_47 = arith.constant 0.000000e+00 : f32
    %129 = vector.broadcast %cst_47 : f32 to vector<8x256xf32>
    %130 = arith.maximumf %128, %129 : vector<8x256xf32>
    %c0_48 = arith.constant 0 : index
    %c8 = arith.constant 8 : index
    %c0_49 = arith.constant 0 : index
    %131 = vector.load %arg8[%c0_48, %c8, %c0_49] : memref<1x16x256xf32, #tpu.memory_space<vmem>>, vector<1x8x256xf32>
    %132 = vector.shape_cast %131 : vector<1x8x256xf32> to vector<8x256xf32>
    %133 = vector.shape_cast %130 : vector<8x256xf32> to vector<1x8x256xf32>
    tpu.vector_store %arg8[%c0_48, %c8, %c0_49], %133 {strides = array<i32>} : memref<1x16x256xf32, #tpu.memory_space<vmem>>, vector<1x8x256xf32>,
    return
  }
  func.func @transform_0(%arg0: i32) -> (i32, i32, i32) {
    %c0_i32 = arith.constant 0 : i32
    %c0_i32_0 = arith.constant 0 : i32
    %c0_i32_1 = arith.constant 0 : i32
    return %arg0, %c0_i32, %c0_i32_0 : i32, i32, i32
  }
  func.func @transform_1(%arg0: i32) -> (i32, i32) {
    %c0_i32 = arith.constant 0 : i32
    %c0_i32_0 = arith.constant 0 : i32
    %c0_i32_1 = arith.constant 0 : i32
    return %c0_i32, %c0_i32_0 : i32, i32
  }
  func.func @transform_2(%arg0: i32) -> (i32, i32) {
    %c0_i32 = arith.constant 0 : i32
    %c0_i32_0 = arith.constant 0 : i32
    %c0_i32_1 = arith.constant 0 : i32
    return %c0_i32, %c0_i32_0 : i32, i32
  }
  func.func @transform_3(%arg0: i32) -> (i32, i32) {
    %c0_i32 = arith.constant 0 : i32
    %c0_i32_0 = arith.constant 0 : i32
    %c0_i32_1 = arith.constant 0 : i32
    return %c0_i32, %c0_i32_0 : i32, i32
  }
  func.func @transform_4(%arg0: i32) -> (i32, i32) {
    %c0_i32 = arith.constant 0 : i32
    %c0_i32_0 = arith.constant 0 : i32
    %c0_i32_1 = arith.constant 0 : i32
    return %c0_i32, %c0_i32_0 : i32, i32
  }
  func.func @transform_5(%arg0: i32) -> (i32, i32, i32, i32) {
    %c0_i32 = arith.constant 0 : i32
    %c0_i32_0 = arith.constant 0 : i32
    %c0_i32_1 = arith.constant 0 : i32
    %c0_i32_2 = arith.constant 0 : i32
    %c0_i32_3 = arith.constant 0 : i32
    return %c0_i32, %c0_i32_0, %c0_i32_1, %c0_i32_2 : i32, i32, i32, i32
  }
  func.func @transform_6(%arg0: i32) -> (i32, i32) {
    %c0_i32 = arith.constant 0 : i32
    %c0_i32_0 = arith.constant 0 : i32
    %c0_i32_1 = arith.constant 0 : i32
    return %c0_i32, %c0_i32_0 : i32, i32
  }
  func.func @transform_7(%arg0: i32) -> (i32, i32, i32) {
    %c0_i32 = arith.constant 0 : i32
    %c0_i32_0 = arith.constant 0 : i32
    %c0_i32_1 = arith.constant 0 : i32
    return %arg0, %c0_i32, %c0_i32_0 : i32, i32, i32
  }
}

</mosaic_0001>

<bundles_post_ra>
// kernel: fire.1
= control target key start
LH: loop header
LB: loop body
LE: loop exit
PB: predicated region body
PF: predicated region fallthrough
CT: control target
= control target key end

     0   :  { %s1171_s24 = smov 0   ;;  %s1443_s0 = inlined_call_operand.vmem [shape: f32[2,4,256], index: 0, kind: input, shape index: {}]   ;;  %s1444_s1 = inlined_call_operand.vmem [shape: f32[4,4], index: 1, kind: input, shape index: {}]   ;;  %s1445_s2 = inlined_call_operand.vmem [shape: f32[4,1], index: 2, kind: input, shape index: {}]   ;;  %s1446_s3 = inlined_call_operand.vmem [shape: f32[8,4], index: 3, kind: input, shape index: {}]   ;;  %s1447_s4 = inlined_call_operand.vmem [shape: f32[8,1], index: 4, kind: input, shape index: {}]   ;;  %s1448_s5 = inlined_call_operand.vmem [shape: f32[3,3,8,4], index: 5, kind: input, shape index: {}]   ;;  %s1449_s6 = inlined_call_operand.vmem [shape: f32[8,1], index: 6, kind: input, shape index: {}]   ;;  %s1450_s7 = inlined_call_operand.vmem [shape: f32[2,16,256], index: 7, kind: output, shape index: {}]  }
   0x1 LB: > { %s1059_s25 = sadd.s32 4294967295, %s1120_s24   ;;  %p1063_p0 = scmp.ge.s32.totalorder %s1120_s24, 1  ;;  %s1120_s24 = sphi %s1171_s24, %s17_s24  }
   0x2   : > { %p237_p1 = scmp.lt.s32.totalorder %s1120_s24, 3 }
   0x4   : > { %p238_p2 = pnand %p1063_p0, %p237_p1 }
   0x5   : > { %p269_p3 = scmp.lt.s32.totalorder (!%p238_p2), %s1059_s25, 1  ;;  %s1123_s9 = smov (!%p238_p2), 111  }
   0x6   : > { %241 = sbr.rel (%p238_p2) target bundleno = 540 (0x21c), region = 48  ;;  %s1124_s10 = smov (!%p238_p2), 113  }
   0x7   : > { %s1125_s13 = smov (!%p238_p2), 127   ;;  %s1126_s14 = smov (!%p238_p2), 1  }
   0x8   : > { %s1127_s15 = smov (!%p238_p2), 16   ;;  %s1128_s16 = smov (!%p238_p2), 15  }
   0x9   : > { %s1129_s17 = smov (!%p238_p2), 17   ;;  %s1130_s18 = smov (!%p238_p2), 112  }
   0xb   : > { %v293_v0 = vld [vmem:[%s1445_s2] sm:$0xf]  ;;  %v393_v1 = vlaneseq  ;;  %v1122_v2 = vmov 0   ;;  %s1460_s25 = smov (!%p269_p3, %s1059_s25), 1  ;;  %vm303_vm6 = vcmask 1041408   ;;  %vm299_vm7 = vcmask 31744  }
   0xc   : > { %1111 = vset.pattern.permute.xlu0 %v1122_v2  ;;  %1112 = vset.pattern.permute.xlu1 %v1122_v2  ;;  %s1092_s28 = sshll.u32 %s1460_s25, 3  ;;  %v291_v17 = vld [vmem:[%s1444_s1] sm:$0xf]  ;;  %vm452_vm8 = vcmask 908288   ;;  %v1222_v28 = vunpack.c.l.b16 %v1122_v2  ;;  %v1225_v29 = vunpack.c.h.b16 %v1122_v2  ;;  %vm575_vm9 = vcmask 924672   ;;  %s1093_s22 = sshll.u32 %s1460_s25, 5 }
   0xd   : > { %296 = vperm.xlu0 %1111, %v293_v0   ;;  %v394_v3 = vand.u32 127, %v393_v1  ;;  %1113 = vset.pattern.permute.xlu2 %v1122_v2  ;;  %s273_s8 = scalar_lea.vmem %s1443_s0, %s1092_s28  ;;  %v292_v21 = vpack.c.bf16 %v291_v17, %v291_v17  ;;  %s1434_s27 = scalar_lea.vmem %s1450_s7, %s1093_s22 }
   0xe   : > { %v282_v7 = vld [vmem:[%s273_s8] sm:$0xff] }
   0xf   : > { %v395_v4 = vadd.s32 128, %v394_v3  ;;  %v400_v5 = vand.u32 15, %v394_v3  ;;  %284 = vst [vmem:[#allocation1] ss:$2 sm:$0xff] %v282_v7 }
  0x11   : > { %v407_v6 = vand.u32 15, %v395_v4  ;;  %vm438_vm0 = vcmp.ge.s32.totalorder %v400_v5, 1  ;;  %vm561_vm1 = vcmp.le.s32.totalorder %v400_v5, 14 }
  0x13   : > { %vm439_vm2 = vcmp.ge.s32.totalorder %v407_v6, 1  ;;  %vm562_vm3 = vcmp.le.s32.totalorder %v407_v6, 14 }
  0x14   : > { %vm444_vm4 = vmpackc.low %vm439_vm2, %vm438_vm0 }
  0x15   : > { %v445_v8 = vsel %vm444_vm4, 65537, %v1122_v2  ;;  %vm567_vm5 = vmpackc.low %vm562_vm3, %vm561_vm1 }
  0x16   : > { %v447_v9 = vperm.slane %v445_v8, 4  ;;  %v446_v10 = vperm.slane %v445_v8, 0  ;;  %v568_v11 = vsel %vm567_vm5, 65537, %v1122_v2  ;;  %v285_v13 = vld.sshfl [vmem:[#allocation1] sm:$0xff pattern:$0x75316420] }
  0x17   : > { %v1193_v12 = vperm.slane %v568_v11, 4  ;;  %v286_v14 = vld.sshfl [vmem:[#allocation1 + $0x8] sm:$0xff pattern:$0x75316420]  ;;  %v289_v15 = vpack.c.bf16 %v285_v13, %v285_v13  ;;  %v1204_v20 = vperm.slane %v568_v11, 0  ;;  %v341_v11 = vld [vmem:[%s1447_s4] sm:$0xff] }
  0x18   : > { %450 = vrot.lane.b32.xlu1 %v447_v9, %s1123_s9  ;;  %448 = vrot.lane.b32.xlu0 %v446_v10, %s1123_s9  ;;  %v290_v16 = vpack.c.bf16 %v286_v14, %v286_v14 }
  0x19   : > { %573 = vrot.lane.b32.xlu2 %v1193_v12, %s1124_s10  ;;  %v305_v18 = vsel %vm303_vm6, %v289_v15, 0 }
  0x1a   : > { %v308_v19 = vsel %vm303_vm6, %v290_v16, 0  ;;  %317 = vmatpush.bf16.msra.mxu0 %v305_v18 }
  0x1b   : > { %330 = vmatpush.bf16.msra.mxu1 %v308_v19 }
  0x1d   : > { %1068 = vmatmul.msk.bf16.vlgmr.msra.gmra.mxu0 %vm299_vm7, %v292_v21 }
  0x1e   : > { %1069 = vmatmul.msk.bf16.vlgmr.msra.gmra.mxu1 %vm299_vm7, %v292_v21 }
  0x20   : > { %571 = vrot.lane.b32.xlu1 %v1204_v20, %s1124_s10  ;;  %643 = vrot.lane.b32.xlu0 %v447_v9, %s1125_s13 }
  0x21   : > { %641 = vrot.lane.b32.xlu2 %v446_v10, %s1125_s13 }
  0x28   : > { %742 = vrot.lane.b32.xlu1 %v1204_v20, %s1126_s14  ;;  %471 = vrot.lane.b32.xlu0 %v1122_v2, %s1127_s15 }
  0x29   : > { %744 = vrot.lane.b32.xlu2 %v1193_v12, %s1126_s14 }
  0x30   : > { %812 = vrot.lane.b32.xlu1 %v447_v9, %s1128_s16  ;;  %810 = vrot.lane.b32.xlu0 %v446_v10, %s1128_s16  ;;  %v424_v10 = vld [vmem:[%s1448_s5 + $0x20] sm:$0xff] }
  0x73   : > { %v574_v36 = vpop.permute.xlu2 %573 }
  0x74   : > { %v584_v55 = vunpack.c.l.b16 %v574_v36  ;;  %v585_v56 = vunpack.c.h.b16 %v574_v36 }
  0x76   : > { %vm588_vm3 = vcmp.ne.s32.totalorder %v584_v55, %v1222_v28  ;;  %vm589_vm4 = vcmp.ne.s32.totalorder %v585_v56, %v1225_v29 }
  0x77   : > { %vm590_vm5 = vmpackc.low %vm589_vm4, %vm588_vm3 }
  0x7b   : > { %v642_v60 = vpop.permute.xlu2 %641 }
  0x7f   : > { %v297_v22 = vpop.permute.xlu0 %296 }
  0x83   : > { %v745_v8 = vpop.permute.xlu2 %744 }
  0x8a   : > { %v451_v23 = vpop.permute.xlu1 %450  ;;  %v449_v24 = vpop.permute.xlu0 %448 }
  0x8b   : > { %v453_v25 = vsel %vm452_vm8, %v449_v24, %v451_v23  ;;  %v461_v44 = vunpack.c.l.b16 %v451_v23  ;;  %v462_v45 = vunpack.c.h.b16 %v451_v23 }
  0x8c   : > { %v454_v30 = vunpack.c.l.b16 %v453_v25  ;;  %v455_v31 = vunpack.c.h.b16 %v453_v25 }
  0x8d   : > { %vm465_vm13 = vcmp.ne.s32.totalorder %v461_v44, %v1222_v28  ;;  %vm466_vm14 = vcmp.ne.s32.totalorder %v462_v45, %v1225_v29 }
  0x8e   : > { %vm1228_vm10 = vcmp.ne.s32.totalorder %v454_v30, %v1222_v28  ;;  %vm1233_vm11 = vcmp.ne.s32.totalorder %v455_v31, %v1225_v29  ;;  %vm467_vm1 = vmpackc.low %vm466_vm14, %vm465_vm13  ;;  %vm671_vm14 = vcmask 7168  }
  0x8f   : > { %vm460_vm12 = vmpackc.low %vm1233_vm11, %vm1228_vm10  ;;  %vm645_vm10 = vcmask 1039360  }
  0x92   : > { %v572_v37 = vpop.permute.xlu1 %571  ;;  %v644_v57 = vpop.permute.xlu0 %643 }
  0x93   : > { %v576_v41 = vsel %vm575_vm9, %v572_v37, %v574_v36  ;;  %v654_v61 = vunpack.c.l.b16 %v644_v57  ;;  %v655_v62 = vunpack.c.h.b16 %v644_v57  ;;  %v646_v1 = vsel %vm645_vm10, %v642_v60, %v644_v57  ;;  %v420_v36 = vld [vmem:[%s1448_s5] sm:$0xff] }
  0x94   : > { %v577_v48 = vunpack.c.l.b16 %v576_v41  ;;  %v578_v49 = vunpack.c.h.b16 %v576_v41  ;;  %v647_v4 = vunpack.c.l.b16 %v646_v1  ;;  %v648_v5 = vunpack.c.h.b16 %v646_v1 }
  0x95   : > { %vm658_vm11 = vcmp.ne.s32.totalorder %v654_v61, %v1222_v28 }
  0x96   : > { %vm581_vm15 = vcmp.ne.s32.totalorder %v577_v48, %v1222_v28  ;;  %vm582_vm0 = vcmp.ne.s32.totalorder %v578_v49, %v1225_v29 }
  0x97   : > { %vm583_vm2 = vmpackc.low %vm582_vm0, %vm581_vm15  ;;  %vm1291_vm15 = vcmp.ne.s32.totalorder %v647_v4, %v1222_v28  ;;  %vm1296_vm0 = vcmp.ne.s32.totalorder %v648_v5, %v1225_v29  ;;  %v423_v5 = vld [vmem:[%s1448_s5 + $0x18] sm:$0xff] }
  0x98   : > { %vm653_vm3 = vmpackc.low %vm1296_vm0, %vm1291_vm15 }
  0x9a   : > { %v319_v26 = vpop.f32.mrf.mxu0  ;;  %v1275_v0 = vpop.permute.xlu0 %471 }
  0x9b   : > { %v332_v27 = vpop.f32.mrf.mxu1  ;;  %v320_v32 = vadd.f32 %v319_v26, %v297_v22  ;;  %v743_v3 = vpop.permute.xlu1 %742 }
  0x9c   : > { %v333_v33 = vadd.f32 %v332_v27, %v297_v22  ;;  %v747_v6 = vunpack.c.l.b16 %v743_v3  ;;  %v748_v7 = vunpack.c.h.b16 %v743_v3  ;;  %v339_v27 = vld [vmem:[%s1446_s3] sm:$0xff] }
  0x9d   : > { %v336_v34 = vmax.f32 %v320_v32, 0.0  ;;  %v340_v30 = vpack.c.bf16 %v339_v27, %v339_v27 }
  0x9e   : > { %v337_v35 = vmax.f32 %v333_v33, 0.0 }
  0xa0   : > { %v338_v38 = vpack.c.bf16 %v337_v35, %v336_v34  ;;  %v421_v34 = vld [vmem:[%s1448_s5 + $0x8] sm:$0xff] }
  0xa1   : > { %v430_v45 = vpack.c.bf16 %v421_v34, %v421_v34 }
  0xa2   : > { %v348_v42 = vunpack.c.l.b16 %v338_v38  ;;  %v349_v43 = vunpack.c.h.b16 %v338_v38  ;;  %v321_v46 = vpop.f32.mrf.mxu0  ;;  %v811_v13 = vpop.permute.xlu0 %810 }
  0xa3   : > { %v334_v47 = vpop.f32.mrf.mxu1  ;;  %v815_v16 = vunpack.c.l.b16 %v811_v13  ;;  %v816_v17 = vunpack.c.h.b16 %v811_v13  ;;  %v813_v18 = vpop.permute.xlu1 %812 }
  0xa4   : > { %v1242_v50 = vpack.c.b16 %v348_v42, %v348_v42  ;;  %v1244_v51 = vpack.c.b16 %v349_v43, %v349_v43  ;;  %v429_v47 = vpack.c.bf16 %v420_v36, %v420_v36 }
  0xa5   : > { %vm820_vm15 = vcmp.ne.s32.totalorder %v816_v17, %v1225_v29  ;;  %v433_v17 = vpack.c.bf16 %v424_v10, %v424_v10 }
  0xa6   : > { %475 = vrot.lane.b32.xlu2 %v1244_v51, %s1127_s15  ;;  %473 = vrot.lane.b32.xlu1 %v1242_v50, %s1127_s15  ;;  %v1252_v52 = vsel %vm303_vm6, %v1244_v51, 0  ;;  %v468_v53 = vsel %vm460_vm12, %v1242_v50, 0  ;;  %v1257_v54 = vsel %vm303_vm6, %v1242_v50, 0  ;;  %v469_v58 = vsel %vm467_vm1, %v1244_v51, 0 }
  0xa7   : > { %381 = vmatpush.bf16.msra.mxu3 %v1252_v52  ;;  %519 = vrot.lane.b32.xlu0 %v468_v53, %s1129_s17  ;;  %v591_v59 = vsel %vm583_vm2, %v1242_v50, 0  ;;  %v592_v63 = vsel %vm590_vm5, %v1244_v51, 0  ;;  %vm659_vm12 = vcmp.ne.s32.totalorder %v655_v62, %v1225_v29  ;;  %vm751_vm1 = vcmp.ne.s32.totalorder %v747_v6, %v1222_v28 }
  0xa8   : > { %368 = vmatpush.bf16.msra.mxu2 %v1257_v54  ;;  %vm660_vm13 = vmpackc.low %vm659_vm12, %vm658_vm11  ;;  %vm752_vm2 = vcmp.ne.s32.totalorder %v748_v7, %v1225_v29  ;;  %vm601_vm5 = vcmask 121856  }
  0xa9   : > { %v662_v9 = vsel %vm660_vm13, %v1244_v51, 0  ;;  %vm753_vm4 = vmpackc.low %vm752_vm2, %vm751_vm1  ;;  %vm819_vm13 = vcmp.ne.s32.totalorder %v815_v16, %v1222_v28  ;;  %v814_v21 = vsel %vm601_vm5, %v811_v13, %v813_v18 }
  0xaa   : > { %v761_v19 = vsel %vm753_vm4, %v1242_v50, 0  ;;  %vm821_vm1 = vmpackc.low %vm820_vm15, %vm819_vm13  ;;  %v822_v22 = vunpack.c.l.b16 %v814_v21  ;;  %v823_v23 = vunpack.c.h.b16 %v814_v21  ;;  %1071 = vmatmul.msk.bf16.vlgmr.msra.gmra.mxu3 %vm299_vm7, %v340_v30 }
  0xab   : > { %v829_v24 = vsel %vm821_vm1, %v1242_v50, 0  ;;  %1070 = vmatmul.msk.bf16.vlgmr.msra.gmra.mxu2 %vm299_vm7, %v340_v30  ;;  %v426_v30 = vld [vmem:[%s1448_s5 + $0x30] sm:$0xff] }
  0xac   : > { %vm826_vm2 = vcmp.ne.s32.totalorder %v822_v22, %v1222_v28  ;;  %v435_v36 = vpack.c.bf16 %v426_v30, %v426_v30 }
  0xae   : > { %517 = vrot.lane.b32.xlu2 %v1122_v2, %s1129_s17  ;;  %521 = vrot.lane.b32.xlu1 %v469_v58, %s1129_s17 }
  0xaf   : > { %597 = vrot.lane.b32.xlu0 %v591_v59, %s1128_s16 }
  0xb6   : > { %595 = vrot.lane.b32.xlu2 %v1122_v2, %s1128_s16  ;;  %599 = vrot.lane.b32.xlu1 %v592_v63, %s1128_s16 }
  0xb7   : > { %926 = vrot.lane.b32.xlu0 %v1193_v12, %s1129_s17  ;;  %v746_v12 = vsel %vm671_vm14, %v743_v3, %v745_v8  ;;  %v432_v8 = vpack.c.bf16 %v423_v5, %v423_v5 }
  0xb8   : > { %v754_v14 = vunpack.c.l.b16 %v746_v12  ;;  %v755_v15 = vunpack.c.h.b16 %v746_v12 }
  0xba   : > { %vm758_vm11 = vcmp.ne.s32.totalorder %v754_v14, %v1222_v28  ;;  %vm759_vm12 = vcmp.ne.s32.totalorder %v755_v15, %v1225_v29 }
  0xbb   : > { %vm760_vm0 = vmpackc.low %vm759_vm12, %vm758_vm11  ;;  %vm477_vm11 = vcmask 130048   ;;  %vm523_vm12 = vcmask 138240  }
  0xbc   : > { %v762_v25 = vsel %vm760_vm0, %v1244_v51, 0 }
  0xbe   : > { %924 = vrot.lane.b32.xlu2 %v1204_v20, %s1129_s17  ;;  %665 = vrot.lane.b32.xlu1 %v1122_v2, %s1126_s14  ;;  %v661_v20 = vsel %vm653_vm3, %v1242_v50, 0  ;;  %vm827_vm3 = vcmp.ne.s32.totalorder %v823_v23, %v1225_v29 }
  0xbf   : > { %669 = vrot.lane.b32.xlu0 %v662_v9, %s1126_s14  ;;  %vm828_vm4 = vmpackc.low %vm827_vm3, %vm826_vm2 }
  0xc0   : > { %v830_v26 = vsel %vm828_vm4, %v1244_v51, 0 }
  0xc6   : > { %765 = vrot.lane.b32.xlu1 %v761_v19, %s1125_s13  ;;  %667 = vrot.lane.b32.xlu2 %v661_v20, %s1126_s14  ;;  %v425_v20 = vld [vmem:[%s1448_s5 + $0x28] sm:$0xff] }
  0xc7   : > { %769 = vrot.lane.b32.xlu0 %v1122_v2, %s1125_s13 }
  0xce   : > { %833 = vrot.lane.b32.xlu1 %v829_v24, %s1124_s10  ;;  %767 = vrot.lane.b32.xlu2 %v762_v25, %s1125_s13 }
  0xcf   : > { %837 = vrot.lane.b32.xlu0 %v1122_v2, %s1124_s10 }
  0xd6   : > { %878 = vrot.lane.b32.xlu1 %v1242_v50, %s1130_s18  ;;  %835 = vrot.lane.b32.xlu2 %v830_v26, %s1124_s10  ;;  %v434_v26 = vpack.c.bf16 %v425_v20, %v425_v20 }
  0xd7   : > { %882 = vrot.lane.b32.xlu0 %v1122_v2, %s1130_s18 }
  0xde   : > { %880 = vrot.lane.b32.xlu2 %v1244_v51, %s1130_s18 }
  0xdf   : > { %951 = vrot.lane.b32.xlu0 %v1122_v2, %s1123_s9 }
 0x100   : > { %v476_v31 = vpop.permute.xlu2 %475 }
 0x108   : > { %v518_v32 = vpop.permute.xlu2 %517 }
 0x110   : > { %v596_v33 = vpop.permute.xlu2 %595 }
 0x118   : > { %v925_v35 = vpop.permute.xlu2 %924  ;;  %v474_v2 = vpop.permute.xlu1 %473 }
 0x119   : > { %v929_v37 = vunpack.c.l.b16 %v925_v35  ;;  %v930_v38 = vunpack.c.h.b16 %v925_v35  ;;  %v520_v39 = vpop.permute.xlu0 %519  ;;  %v478_v40 = vsel %vm477_vm11, %v1275_v0, %v474_v2  ;;  %v479_v41 = vsel %vm477_vm11, %v474_v2, %v476_v31 }
 0x11a   : > { %v484_v42 = vsel %vm303_vm6, %v478_v40, 0  ;;  %v487_v43 = vsel %vm303_vm6, %v479_v41, 0  ;;  %v524_v44 = vsel %vm523_vm12, %v518_v32, %v520_v39  ;;  %v992_v40 = vld [vmem:[%s1449_s6] sm:$0xff] }
 0x11b   : > { %496 = vmatpush.bf16.msrb.mxu0 %v484_v42  ;;  %509 = vmatpush.bf16.msrb.mxu1 %v487_v43  ;;  %v530_v46 = vsel %vm303_vm6, %v524_v44, 0  ;;  %vm933_vm13 = vcmp.ne.s32.totalorder %v929_v37, %v1222_v28  ;;  %vm934_vm15 = vcmp.ne.s32.totalorder %v930_v38, %v1225_v29  ;;  %v427_v38 = vld [vmem:[%s1448_s5 + $0x38] sm:$0xff]  ;;  %v428_v44 = vld [vmem:[%s1448_s5 + $0x40] sm:$0xff] }
 0x11c   : > { %542 = vmatpush.bf16.msrb.mxu2 %v530_v46  ;;  %vm935_vm0 = vmpackc.low %vm934_vm15, %vm933_vm13 }
 0x11d   : > { %v943_v48 = vsel %vm935_vm0, %v1242_v50, 0  ;;  %v422_v50 = vld [vmem:[%s1448_s5 + $0x10] sm:$0xff] }
 0x11e   : > { %947 = vrot.lane.b32.xlu1 %v943_v48, %s1123_s9  ;;  %1072 = vmatmul.msk.bf16.vlgmr.msrb.gmra.mxu0 %vm299_vm7, %v430_v45  ;;  %v431_v1 = vpack.c.bf16 %v422_v50, %v422_v50 }
 0x11f   : > { %1073 = vmatmul.msk.bf16.vlgmr.msrb.gmra.mxu1 %vm299_vm7, %v430_v45  ;;  %1074 = vmatmul.msk.bf16.vlgmr.msrb.gmra.mxu2 %vm299_vm7, %v429_v47 }
 0x120   : > { %v522_v49 = vpop.permute.xlu1 %521  ;;  %v668_v62 = vpop.permute.xlu2 %667 }
 0x121   : > { %v598_v53 = vpop.permute.xlu0 %597  ;;  %v525_v55 = vsel %vm523_vm12, %v520_v39, %v522_v49  ;;  %v436_v39 = vpack.c.bf16 %v427_v38, %v427_v38 }
 0x122   : > { %v602_v56 = vsel %vm601_vm5, %v596_v33, %v598_v53  ;;  %v533_v57 = vsel %vm303_vm6, %v525_v55, 0 }
 0x123   : > { %v608_v58 = vsel %vm303_vm6, %v602_v56, 0  ;;  %555 = vmatpush.bf16.msrb.mxu3 %v533_v57 }
 0x124   : > { %620 = vmatpush.bf16.msra.mxu0 %v608_v58 }
 0x126   : > { %1075 = vmatmul.msk.bf16.vlgmr.msrb.gmra.mxu3 %vm299_vm7, %v429_v47  ;;  %344 = vperm.xlu1 %1112, %v341_v11  }
 0x128   : > { %721 = vmatpush.bf16.msrb.mxu0 %v1257_v54  ;;  %v600_v59 = vpop.permute.xlu1 %599 }
 0x129   : > { %v603_v60 = vsel %vm601_vm5, %v598_v53, %v600_v59  ;;  %v927_v61 = vpop.permute.xlu0 %926  ;;  %v437_v53 = vpack.c.bf16 %v428_v44, %v428_v44 }
 0x12a   : > { %v611_v63 = vsel %vm303_vm6, %v603_v60, 0  ;;  %v928_v0 = vsel %vm523_vm12, %v925_v35, %v927_v61 }
 0x12b   : > { %v936_v3 = vunpack.c.l.b16 %v928_v0  ;;  %v937_v4 = vunpack.c.h.b16 %v928_v0  ;;  %633 = vmatpush.bf16.msra.mxu1 %v611_v63 }
 0x12d   : > { %vm940_vm1 = vcmp.ne.s32.totalorder %v936_v3, %v1222_v28  ;;  %vm941_vm2 = vcmp.ne.s32.totalorder %v937_v4, %v1225_v29  ;;  %v383_v42 = vpop.f32.mrf.mxu3 }
 0x12e   : > { %vm942_vm3 = vmpackc.low %vm941_vm2, %vm940_vm1  ;;  %1076 = vmatmul.msk.bf16.vlgmr.msra.gmra.mxu0 %vm299_vm7, %v431_v1  ;;  %v370_v41 = vpop.f32.mrf.mxu2 }
 0x12f   : > { %734 = vmatpush.bf16.msrb.mxu1 %v1252_v52  ;;  %v944_v54 = vsel %vm942_vm3, %v1244_v51, 0  ;;  %v768_v51 = vpop.permute.xlu2 %767 }
 0x130   : > { %1077 = vmatmul.msk.bf16.vlgmr.msra.gmra.mxu1 %vm299_vm7, %v431_v1  ;;  %v666_v6 = vpop.permute.xlu1 %665  ;;  %949 = vrot.lane.b32.xlu2 %v944_v54, %s1123_s9 }
 0x131   : > { %v672_v52 = vsel %vm671_vm14, %v666_v6, %v668_v62  ;;  %v670_v7 = vpop.permute.xlu0 %669 }
 0x132   : > { %v678_v28 = vsel %vm303_vm6, %v672_v52, 0  ;;  %v673_v29 = vsel %vm671_vm14, %v668_v62, %v670_v7 }
 0x133   : > { %v681_v9 = vsel %vm303_vm6, %v673_v29, 0  ;;  %690 = vmatpush.bf16.msra.mxu2 %v678_v28 }
 0x134   : > { %703 = vmatpush.bf16.msra.mxu3 %v681_v9 }
 0x135   : > { %v385_v46 = vpop.f32.mrf.mxu3 }
 0x136   : > { %1078 = vmatmul.msk.bf16.vlgmr.msra.gmra.mxu2 %vm299_vm7, %v432_v8  ;;  %v372_v45 = vpop.f32.mrf.mxu2 }
 0x137   : > { %1079 = vmatmul.msk.bf16.vlgmr.msra.gmra.mxu3 %vm299_vm7, %v432_v8  ;;  %v836_v19 = vpop.permute.xlu2 %835 }
 0x138   : > { %v766_v12 = vpop.permute.xlu1 %765  ;;  %995 = vperm.xlu2 %1113, %v992_v40  }
 0x139   : > { %v771_v13 = vsel %vm645_vm10, %v766_v12, %v768_v51  ;;  %v770_v14 = vpop.permute.xlu0 %769 }
 0x13a   : > { %v777_v15 = vsel %vm303_vm6, %v771_v13, 0  ;;  %v772_v16 = vsel %vm645_vm10, %v768_v51, %v770_v14  ;;  %vm884_vm10 = vcmask 916480  }
 0x13b   : > { %v780_v18 = vsel %vm303_vm6, %v772_v16, 0  ;;  %789 = vmatpush.bf16.msrb.mxu2 %v777_v15 }
 0x13c   : > { %802 = vmatpush.bf16.msrb.mxu3 %v780_v18 }
 0x13e   : > { %1080 = vmatmul.msk.bf16.vlgmr.msrb.gmra.mxu0 %vm299_vm7, %v433_v17 }
 0x13f   : > { %v881_v31 = vpop.permute.xlu2 %880 }
 0x140   : > { %1081 = vmatmul.msk.bf16.vlgmr.msrb.gmra.mxu1 %vm299_vm7, %v433_v17  ;;  %v834_v21 = vpop.permute.xlu1 %833 }
 0x141   : > { %v839_v22 = vsel %vm575_vm9, %v834_v21, %v836_v19  ;;  %v838_v23 = vpop.permute.xlu0 %837 }
 0x142   : > { %v845_v24 = vsel %vm303_vm6, %v839_v22, 0  ;;  %v840_v25 = vsel %vm575_vm9, %v836_v19, %v838_v23 }
 0x143   : > { %v848_v27 = vsel %vm303_vm6, %v840_v25, 0  ;;  %857 = vmatpush.bf16.msra.mxu0 %v845_v24 }
 0x144   : > { %870 = vmatpush.bf16.msra.mxu1 %v848_v27 }
 0x146   : > { %1082 = vmatmul.msk.bf16.vlgmr.msrb.gmra.mxu2 %vm299_vm7, %v434_v26 }
 0x147   : > { %1083 = vmatmul.msk.bf16.vlgmr.msrb.gmra.mxu3 %vm299_vm7, %v434_v26 }
 0x148   : > { %v879_v32 = vpop.permute.xlu1 %878 }
 0x149   : > { %v885_v33 = vsel %vm884_vm10, %v879_v32, %v881_v31  ;;  %v883_v34 = vpop.permute.xlu0 %882 }
 0x14a   : > { %v891_v35 = vsel %vm303_vm6, %v885_v33, 0  ;;  %v886_v2 = vsel %vm884_vm10, %v881_v31, %v883_v34 }
 0x14b   : > { %v894_v37 = vsel %vm303_vm6, %v886_v2, 0  ;;  %903 = vmatpush.bf16.msra.mxu2 %v891_v35 }
 0x14c   : > { %916 = vmatpush.bf16.msra.mxu3 %v894_v37 }
 0x14e   : > { %1084 = vmatmul.msk.bf16.vlgmr.msra.gmra.mxu0 %vm299_vm7, %v435_v36 }
 0x150   : > { %1085 = vmatmul.msk.bf16.vlgmr.msra.gmra.mxu1 %vm299_vm7, %v435_v36 }
 0x151   : > { %v952_v43 = vpop.permute.xlu0 %951 }
 0x156   : > { %1086 = vmatmul.msk.bf16.vlgmr.msra.gmra.mxu2 %vm299_vm7, %v436_v39 }
 0x157   : > { %1087 = vmatmul.msk.bf16.vlgmr.msra.gmra.mxu3 %vm299_vm7, %v436_v39 }
 0x18a   : > { %v950_v47 = vpop.permute.xlu2 %949 }
 0x18b   : > { %v954_v48 = vsel %vm452_vm8, %v950_v47, %v952_v43 }
 0x18c   : > { %v962_v49 = vsel %vm303_vm6, %v954_v48, 0 }
 0x18d   : > { %984 = vmatpush.bf16.msrb.mxu1 %v962_v49 }
 0x190   : > { %v948_v55 = vpop.permute.xlu1 %947  ;;  %1089 = vmatmul.msk.bf16.vlgmr.msrb.gmra.mxu1 %vm299_vm7, %v437_v53 }
 0x191   : > { %v953_v56 = vsel %vm452_vm8, %v948_v55, %v950_v47 }
 0x192   : > { %v959_v57 = vsel %vm303_vm6, %v953_v56, 0 }
 0x193   : > { %971 = vmatpush.bf16.msrb.mxu0 %v959_v57 }
 0x196   : > { %1088 = vmatmul.msk.bf16.vlgmr.msrb.gmra.mxu0 %vm299_vm7, %v437_v53 }
 0x198   : > { %v345_v4 = vpop.permute.xlu1 %344 }
 0x199   : > { %v371_v6 = vadd.f32 %v370_v41, %v345_v4  ;;  %v384_v52 = vadd.f32 %v383_v42, %v345_v4  ;;  %v996_v41 = vpop.permute.xlu2 %995 }
 0x19b   : > { %v498_v58 = vpop.f32.mrf.mxu0  ;;  %v387_v28 = vmax.f32 %v371_v6, 0.0  ;;  %v388_v29 = vmax.f32 %v384_v52, 0.0 }
 0x19c   : > { %v511_v50 = vpop.f32.mrf.mxu1 }
 0x19d   : > { %389 = vst [vmem:[%s1434_s27] sm:$0xff] %v387_v28 }
 0x19e   : > { %390 = vst [vmem:[%s1434_s27 + $0x8] sm:$0xff] %v388_v29 }
 0x1a2   : > { %v544_v59 = vpop.f32.mrf.mxu2 }
 0x1a3   : > { %v545_v60 = vadd.f32 %v544_v59, %v498_v58  ;;  %v500_v61 = vpop.f32.mrf.mxu0 }
 0x1a4   : > { %v513_v62 = vpop.f32.mrf.mxu1 }
 0x1a9   : > { %v557_v63 = vpop.f32.mrf.mxu3 }
 0x1aa   : > { %v558_v0 = vadd.f32 %v557_v63, %v511_v50  ;;  %v546_v1 = vpop.f32.mrf.mxu2 }
 0x1ab   : > { %v622_v3 = vpop.f32.mrf.mxu0 }
 0x1ac   : > { %v639_v54 = vadd.f32 %v622_v3, %v545_v60 }
 0x1ad   : > { %v635_v5 = vpop.f32.mrf.mxu1 }
 0x1ae   : > { %v640_v7 = vadd.f32 %v635_v5, %v558_v0 }
 0x1b1   : > { %v559_v8 = vpop.f32.mrf.mxu3 }
 0x1b3   : > { %v624_v9 = vpop.f32.mrf.mxu0 }
 0x1b5   : > { %v637_v51 = vpop.f32.mrf.mxu1 }
 0x1b9   : > { %v692_v10 = vpop.f32.mrf.mxu2 }
 0x1ba   : > { %v709_v11 = vadd.f32 %v692_v10, %v639_v54  ;;  %v705_v12 = vpop.f32.mrf.mxu3 }
 0x1bb   : > { %v710_v13 = vadd.f32 %v705_v12, %v640_v7  ;;  %v723_v14 = vpop.f32.mrf.mxu0 }
 0x1bc   : > { %v740_v15 = vadd.f32 %v723_v14, %v709_v11 }
 0x1bd   : > { %v736_v16 = vpop.f32.mrf.mxu1 }
 0x1be   : > { %v741_v17 = vadd.f32 %v736_v16, %v710_v13 }
 0x1c1   : > { %v694_v18 = vpop.f32.mrf.mxu2 }
 0x1c2   : > { %v707_v19 = vpop.f32.mrf.mxu3 }
 0x1c3   : > { %v725_v20 = vpop.f32.mrf.mxu0 }
 0x1c5   : > { %v738_v21 = vpop.f32.mrf.mxu1 }
 0x1c9   : > { %v791_v22 = vpop.f32.mrf.mxu2 }
 0x1ca   : > { %v808_v23 = vadd.f32 %v791_v22, %v740_v15  ;;  %v804_v24 = vpop.f32.mrf.mxu3 }
 0x1cb   : > { %v859_v25 = vpop.f32.mrf.mxu0  ;;  %v809_v37 = vadd.f32 %v804_v24, %v741_v17 }
 0x1cc   : > { %v876_v26 = vadd.f32 %v859_v25, %v808_v23 }
 0x1cd   : > { %v872_v27 = vpop.f32.mrf.mxu1 }
 0x1ce   : > { %v877_v38 = vadd.f32 %v872_v27, %v809_v37 }
 0x1d1   : > { %v793_v30 = vpop.f32.mrf.mxu2 }
 0x1d2   : > { %v806_v31 = vpop.f32.mrf.mxu3 }
 0x1d3   : > { %v861_v32 = vpop.f32.mrf.mxu0 }
 0x1d5   : > { %v874_v33 = vpop.f32.mrf.mxu1 }
 0x1d9   : > { %v905_v34 = vpop.f32.mrf.mxu2 }
 0x1da   : > { %v918_v35 = vpop.f32.mrf.mxu3  ;;  %v922_v44 = vadd.f32 %v905_v34, %v876_v26 }
 0x1db   : > { %v923_v39 = vadd.f32 %v918_v35, %v877_v38 }
 0x1e1   : > { %v907_v2 = vpop.f32.mrf.mxu2 }
 0x1e2   : > { %v920_v36 = vpop.f32.mrf.mxu3 }
 0x20d   : > { %v986_v40 = vpop.f32.mrf.mxu1 }
 0x20e   : > { %v991_v42 = vadd.f32 %v986_v40, %v923_v39 }
 0x210   : > { %v999_v43 = vadd.f32 %v996_v41, %v991_v42 }
 0x212   : > { %v1001_v45 = vmax.f32 %v999_v43, 0.0 }
 0x213   : > { %v973_v46 = vpop.f32.mrf.mxu0 }
 0x214   : > { %1003 = vst [vmem:[%s1434_s27 + $0x18] sm:$0xff] %v1001_v45  ;;  %v990_v47 = vadd.f32 %v973_v46, %v922_v44 }
 0x215   : > { %v988_v48 = vpop.f32.mrf.mxu1 }
 0x216   : > { %v998_v49 = vadd.f32 %v996_v41, %v990_v47 }
 0x218   : > { %v1000_v53 = vmax.f32 %v998_v49, 0.0 }
 0x21a   : > { %1002 = vst [vmem:[%s1434_s27 + $0x10] sm:$0xff] %v1000_v53 }
 0x21b   : > { %v975_v55 = vpop.f32.mrf.mxu0 }
 0x21c PF: > { %s17_s24 = sadd.s32 1, %s1120_s24  }
 0x21d   : > { %p14_p4 = scmp.ge.s32.totalorder %s17_s24, 4  }
 0x21f   :  { %16 = sbr.rel (!%p14_p4) target bundleno = 1 (0x1), region = 78 }

</bundles_post_ra>
